<compile_context>
chip_gen: v5e
topology: v5e:2x2
jax: 0.10.0
libtpu: 0.0.40
codegen_flags: <defaults>
</compile_context>

<pallas_src>
import functools
import math

import jax
import jax.numpy as jnp
from jax import lax
from jax.experimental import pallas as pl
from jax.experimental.pallas import tpu as pltpu


_NEG_INF = -1e30  # large finite negative: avoids exp(-inf - -inf) = NaN paths

# VMEM budget: 64 MiB fits every generation (v7x has 64 MiB/TC); raise toward
# ~100 MiB on v5e/v6e if larger tiles are wanted.
_VMEM_LIMIT_BYTES = 64 * 1024 * 1024


def _layer_norm(v, gamma, beta, eps=1e-5):
    mu = jnp.mean(v, axis=-1, keepdims=True)
    var = jnp.mean((v - mu) ** 2, axis=-1, keepdims=True)
    return (v - mu) * lax.rsqrt(var + eps) * gamma + beta


def _gelu_exact(x):
    # torch.nn.functional.gelu default is the exact erf-based GELU.
    return 0.5 * x * (1.0 + lax.erf(x * (1.0 / math.sqrt(2.0))))


def _invariant(shape, index_map):
    """BlockSpec for a loop-invariant operand: single-buffered (halves VMEM)."""
    return pl.BlockSpec(shape, index_map,
                        pipeline_mode=pl.Buffered(buffer_count=1))


# ---------------------------------------------------------------------------
# Kernel 1: pre-LN QKV projection, per-head weight streaming, head-major out.
# ---------------------------------------------------------------------------
def _qkv_proj_kernel(x_ref, wqkv_ref, g1_ref, be1_ref,
                     q_ref, k_ref, v_ref, xn_sc, *, head_dim):
    h = pl.program_id(2)

    @pl.when(h == 0)
    def _():
        # LayerNorm computed once per row tile (fp32), cached bf16 for the MXU.
        xn = _layer_norm(x_ref[0], g1_ref[...], be1_ref[...])
        xn_sc[...] = xn.astype(jnp.bfloat16)

    hd = head_dim
    qkv = jnp.dot(xn_sc[...], wqkv_ref[0],
                  preferred_element_type=jnp.float32)      # (Ts, 3*hd)
    q_ref[0, 0] = qkv[:, :hd].astype(jnp.bfloat16)          # scale pre-folded
    k_ref[0, 0] = qkv[:, hd:2 * hd].astype(jnp.bfloat16)
    v_ref[0, 0] = qkv[:, 2 * hd:].astype(jnp.bfloat16)


def _qkv_proj_call(x, w_qkv, g1, be1, num_heads, head_dim, s_tile):
    B, S, D = x.shape
    H, hd = num_heads, head_dim
    n_s = S // s_tile
    kernel = functools.partial(_qkv_proj_kernel, head_dim=hd)
    qkv_shape = jax.ShapeDtypeStruct((B, H, S, hd), jnp.bfloat16)
    out_spec = pl.BlockSpec((1, 1, s_tile, hd), lambda b, i, h: (b, h, i, 0))
    return pl.pallas_call(
        kernel,
        out_shape=(qkv_shape, qkv_shape, qkv_shape),
        grid_spec=pltpu.PrefetchScalarGridSpec(
            num_scalar_prefetch=0,
            grid=(B, n_s, H),
            in_specs=[
                pl.BlockSpec((1, s_tile, D), lambda b, i, h: (b, i, 0)),
                pl.BlockSpec((1, D, 3 * hd), lambda b, i, h: (h, 0, 0)),
                _invariant((1, D), lambda b, i, h: (0, 0)),
                _invariant((1, D), lambda b, i, h: (0, 0)),
            ],
            out_specs=(out_spec, out_spec, out_spec),
            scratch_shapes=[pltpu.VMEM((s_tile, D), jnp.bfloat16)],
        ),
        compiler_params=pltpu.CompilerParams(
            dimension_semantics=("parallel", "parallel", "arbitrary"),
            vmem_limit_bytes=_VMEM_LIMIT_BYTES),
    )(x, w_qkv, g1, be1)


# ---------------------------------------------------------------------------
# Kernel 2: flash attention over streamed KV tiles + output proj + residual.
# ---------------------------------------------------------------------------
def _flash_attn_kernel(x_ref, q_ref, k_ref, v_ref, wo_ref, o_ref,
                       m_sc, l_sc, acc_sc, *, q_tile, kv_tile):
    qi = pl.program_id(1)
    kj = pl.program_id(2)
    n_kv = pl.num_programs(2)

    @pl.when(kj == 0)
    def _():
        m_sc[...] = jnp.full_like(m_sc, -jnp.inf)
        l_sc[...] = jnp.zeros_like(l_sc)
        acc_sc[...] = jnp.zeros_like(acc_sc)

    # Causal block skipping: KV tiles strictly above the diagonal do no work
    # (and their DMA is elided by the clamped index_map in the caller).
    @pl.when(kj <= qi)
    def _():
        q = q_ref[0]                                       # (H, Tq, hd) bf16
        k = k_ref[0]                                       # (H, Tk, hd) bf16
        v = v_ref[0]
        s = jnp.einsum("hqd,hkd->hqk", q, k,
                       preferred_element_type=jnp.float32)  # (H, Tq, Tk) fp32
        row_ids = qi * q_tile + lax.broadcasted_iota(
            jnp.int32, (q_tile, kv_tile), 0)
        col_ids = kj * kv_tile + lax.broadcasted_iota(
            jnp.int32, (q_tile, kv_tile), 1)
        s = jnp.where((col_ids <= row_ids)[None, :, :], s, _NEG_INF)

        m_new = jnp.maximum(m_sc[...], jnp.max(s, axis=-1, keepdims=True))
        alpha = jnp.exp(m_sc[...] - m_new)
        p = jnp.exp(s - m_new)
        l_sc[...] = alpha * l_sc[...] + jnp.sum(p, axis=-1, keepdims=True)
        acc_sc[...] = alpha * acc_sc[...] + jnp.einsum(
            "hqk,hkd->hqd", p.astype(jnp.bfloat16), v,
            preferred_element_type=jnp.float32)
        m_sc[...] = m_new

    @pl.when(kj == n_kv - 1)
    def _():
        H, Tq, hd = acc_sc.shape
        ctx = acc_sc[...] / l_sc[...]                      # exact normalize
        ctx = jnp.swapaxes(ctx, 0, 1).reshape(Tq, H * hd)  # (Tq, D)
        attn = jnp.dot(ctx.astype(jnp.bfloat16), wo_ref[...],
                       preferred_element_type=jnp.float32)
        o_ref[0] = x_ref[0] + attn                         # residual add


def _attention_call(x, q, k, v, wo, num_heads, head_dim, q_tile, kv_tile):
    B, S, D = x.shape
    H, hd = num_heads, head_dim
    n_q = S // q_tile
    n_kv = S // kv_tile
    kernel = functools.partial(_flash_attn_kernel, q_tile=q_tile,
                               kv_tile=kv_tile)
    # Clamp KV tile index to the diagonal: above-diagonal steps re-use the
    # already-resident block (no DMA) and the compute is skipped by pl.when.
    kv_idx = lambda b, qi, kj: (b, 0, jnp.minimum(kj, qi), 0)
    row_spec = pl.BlockSpec((1, q_tile, D), lambda b, qi, kj: (b, qi, 0))
    # TODO(synk): for very large D on v7x, also stream wo over output chunks.
    return pl.pallas_call(
        kernel,
        out_shape=jax.ShapeDtypeStruct((B, S, D), jnp.float32),
        grid_spec=pltpu.PrefetchScalarGridSpec(
            num_scalar_prefetch=0,
            grid=(B, n_q, n_kv),
            in_specs=[
                row_spec,                                               # x (residual)
                pl.BlockSpec((1, H, q_tile, hd),
                             lambda b, qi, kj: (b, 0, qi, 0)),          # Q (bf16)
                pl.BlockSpec((1, H, kv_tile, hd), kv_idx),              # K (bf16)
                pl.BlockSpec((1, H, kv_tile, hd), kv_idx),              # V (bf16)
                _invariant((D, D), lambda b, qi, kj: (0, 0)),           # wo (bf16)
            ],
            out_specs=row_spec,
            scratch_shapes=[
                pltpu.VMEM((H, q_tile, 1), jnp.float32),   # m
                pltpu.VMEM((H, q_tile, 1), jnp.float32),   # l
                pltpu.VMEM((H, q_tile, hd), jnp.float32),  # acc
            ],
        ),
        # Q axis kept "arbitrary": the causal workload is triangular, so on
        # dual-TC v7x we parallelize over batch instead to stay load-balanced.
        compiler_params=pltpu.CompilerParams(
            dimension_semantics=("parallel", "arbitrary", "arbitrary"),
            vmem_limit_bytes=_VMEM_LIMIT_BYTES),
    )(x, q, k, v, wo)


# ---------------------------------------------------------------------------
# Kernel 3: pre-LN FFN with d_ff streamed over a chunk axis + residual.
# ---------------------------------------------------------------------------
def _ffn_kernel(x_ref, w1_ref, b1_ref, w2_ref, b2_ref, g2_ref, be2_ref,
                o_ref, xn_sc, acc_sc):
    c = pl.program_id(2)
    n_c = pl.num_programs(2)

    @pl.when(c == 0)
    def _():
        xn = _layer_norm(x_ref[0], g2_ref[...], be2_ref[...])
        xn_sc[...] = xn.astype(jnp.bfloat16)
        acc_sc[...] = jnp.zeros_like(acc_sc)

    h1 = jnp.dot(xn_sc[...], w1_ref[...],
                 preferred_element_type=jnp.float32) + b1_ref[...]
    h1 = _gelu_exact(h1)                                   # exact erf GELU fp32
    acc_sc[...] += jnp.dot(h1.astype(jnp.bfloat16), w2_ref[...],
                           preferred_element_type=jnp.float32)

    @pl.when(c == n_c - 1)
    def _():
        o_ref[0] = x_ref[0] + acc_sc[...] + b2_ref[...]    # residual add
        # dropout layers are identity in inference (eval) mode.


def _ffn_call(x1, w1, b1, w2, b2, g2, be2, m_tile, ff_chunk):
    B, S, D = x1.shape
    d_ff = w1.shape[1]
    n_m = S // m_tile
    n_c = d_ff // ff_chunk
    row_spec = pl.BlockSpec((1, m_tile, D), lambda b, i, c: (b, i, 0))
    return pl.pallas_call(
        _ffn_kernel,
        out_shape=jax.ShapeDtypeStruct((B, S, D), jnp.float32),
        grid_spec=pltpu.PrefetchScalarGridSpec(
            num_scalar_prefetch=0,
            grid=(B, n_m, n_c),
            in_specs=[
                row_spec,                                              # x1 (residual)
                pl.BlockSpec((D, ff_chunk), lambda b, i, c: (0, c)),   # w1 chunk (bf16)
                pl.BlockSpec((1, ff_chunk), lambda b, i, c: (0, c)),   # b1 chunk
                pl.BlockSpec((ff_chunk, D), lambda b, i, c: (c, 0)),   # w2 chunk (bf16)
                _invariant((1, D), lambda b, i, c: (0, 0)),            # b2
                _invariant((1, D), lambda b, i, c: (0, 0)),            # ff_norm gamma
                _invariant((1, D), lambda b, i, c: (0, 0)),            # ff_norm beta
            ],
            out_specs=row_spec,
            scratch_shapes=[
                pltpu.VMEM((m_tile, D), jnp.bfloat16),     # cached LN(x1)
                pltpu.VMEM((m_tile, D), jnp.float32),      # h2 accumulator
            ],
        ),
        compiler_params=pltpu.CompilerParams(
            dimension_semantics=("parallel", "parallel", "arbitrary"),
            vmem_limit_bytes=_VMEM_LIMIT_BYTES),
    )(x1, w1, b1, w2, b2, g2, be2)


# ---------------------------------------------------------------------------
# Parameter prep (one-time / offline) and top-level wrapper.
# ---------------------------------------------------------------------------
def prepare_params(params, num_heads):
    """One-time weight prep: bf16 casts, head-major QKV fusion, 1/sqrt(hd)
    folded into wq.  Do this at parameter-load time, not per forward call."""
    D = params["wq"].shape[0]
    hd = D // num_heads
    heads = lambda w: w.reshape(D, num_heads, hd).transpose(1, 0, 2)  # (H,D,hd)
    w_qkv = jnp.concatenate(
        [heads(params["wq"] * (1.0 / math.sqrt(hd))),
         heads(params["wk"]),
         heads(params["wv"])], axis=-1).astype(jnp.bfloat16)          # (H,D,3hd)
    return {
        "w_qkv": w_qkv,
        "wo": params["wo"].astype(jnp.bfloat16),
        "w1": params["w1"].astype(jnp.bfloat16),
        "b1": params["b1"],
        "w2": params["w2"].astype(jnp.bfloat16),
        "b2": params["b2"],
        "g1": params["g1"], "be1": params["be1"],
        "g2": params["g2"], "be2": params["be2"],
    }


def transformer_layer(x, prepared, num_heads, *, s_tile=None, q_tile=None,
                      kv_tile=None, m_tile=None, ff_chunk=None):
    """x: [B, S, D] float32. prepared: dict from prepare_params()."""
    B, S, D = x.shape
    hd = D // num_heads
    d_ff = prepared["w1"].shape[1]
    # Tile guidance: 128 on v5e (4x128^2 MXU); 256 on v6e/v7x (2x256^2 MXU),
    # which fits the 64 MiB vmem limit because weights/KV are streamed.
    s_tile = s_tile if s_tile is not None else min(S, 256)
    q_tile = q_tile if q_tile is not None else min(S, 256)
    kv_tile = kv_tile if kv_tile is not None else min(S, 256)
    m_tile = m_tile if m_tile is not None else min(S, 256)
    ff_chunk = ff_chunk if ff_chunk is not None else min(d_ff, 512)
    assert S % s_tile == 0 and S % q_tile == 0
    assert S % kv_tile == 0 and S % m_tile == 0
    assert d_ff % ff_chunk == 0

    # 1) LN + QKV projection once per sequence, head-major bf16 outputs.
    q, k, v = _qkv_proj_call(x, prepared["w_qkv"], prepared["g1"],
                             prepared["be1"], num_heads, hd, s_tile)
    # 2) Flash attention over streamed KV tiles + wo + residual.
    x1 = _attention_call(x, q, k, v, prepared["wo"], num_heads, hd,
                         q_tile, kv_tile)
    # 3) Pre-LN FFN with d_ff chunk streaming + residual.
    return _ffn_call(x1, prepared["w1"], prepared["b1"], prepared["w2"],
                     prepared["b2"], prepared["g2"], prepared["be2"],
                     m_tile, ff_chunk)


# ---------------------------------------------------------------------------
# Pure-JAX fp32 reference (mirrors the PyTorch forward, eval mode).
# ---------------------------------------------------------------------------
def transformer_layer_ref(x, params, num_heads):
    B, S, D = x.shape
    head_dim = D // num_heads
    residual = x
    xn = _layer_norm(x, params["g1"], params["be1"])
    q = xn @ params["wq"]
    k = xn @ params["wk"]
    v = xn @ params["wv"]
    reshape_h = lambda t: t.reshape(B, S, num_heads, head_dim).transpose(0, 2, 1, 3)
    q, k, v = reshape_h(q), reshape_h(k), reshape_h(v)
    scores = jnp.einsum("bhqd,bhkd->bhqk", q, k) / math.sqrt(head_dim)
    mask = jnp.triu(jnp.ones((S, S), bool), k=1)
    scores = jnp.where(mask, -jnp.inf, scores)
    attn = jax.nn.softmax(scores, axis=-1)
    ctx = jnp.einsum("bhqk,bhkd->bhqd", attn, v)
    ctx = ctx.transpose(0, 2, 1, 3).reshape(B, S, D)
    x = residual + ctx @ params["wo"]
    residual = x
    xn2 = _layer_norm(x, params["g2"], params["be2"])
    h1 = _gelu_exact(xn2 @ params["w1"] + params["b1"])
    h2 = h1 @ params["w2"] + params["b2"]
    return residual + h2


if __name__ == "__main__":
    d_model, num_heads, d_ff = 32, 4, 256
    batch, seq = 2, 32   # seq=32 with 16-wide tiles exercises the flash loop;
                         # d_ff=256 with 128-wide chunks exercises FFN streaming.

    key = jax.random.PRNGKey(0)
    keys = jax.random.split(key, 10)
    s = 0.1
    params = {
        "wq": s * jax.random.normal(keys[0], (d_model, d_model), jnp.float32),
        "wk": s * jax.random.normal(keys[1], (d_model, d_model), jnp.float32),
        "wv": s * jax.random.normal(keys[2], (d_model, d_model), jnp.float32),
        "wo": s * jax.random.normal(keys[3], (d_model, d_model), jnp.float32),
        "w1": s * jax.random.normal(keys[4], (d_model, d_ff), jnp.float32),
        "b1": s * jax.random.normal(keys[5], (1, d_ff), jnp.float32),
        "w2": s * jax.random.normal(keys[6], (d_ff, d_model), jnp.float32),
        "b2": s * jax.random.normal(keys[7], (1, d_model), jnp.float32),
        "g1": jnp.ones((1, d_model), jnp.float32),   # nn.LayerNorm default init
        "be1": jnp.zeros((1, d_model), jnp.float32),
        "g2": jnp.ones((1, d_model), jnp.float32),
        "be2": jnp.zeros((1, d_model), jnp.float32),
    }

    x = jax.random.normal(keys[8], (batch, seq, d_model), jnp.float32)

    prepared = prepare_params(params, num_heads)
    out = transformer_layer(x, prepared, num_heads,
                            s_tile=16, q_tile=16, kv_tile=16,
                            m_tile=16, ff_chunk=128)
    out = jax.block_until_ready(out)

    ref = transformer_layer_ref(x, params, num_heads)
    # bf16 MXU operands => compare to the fp32 reference loosely.
    assert jnp.allclose(out, ref, atol=5e-2, rtol=5e-2), (
        "max abs err = " + str(float(jnp.max(jnp.abs(out - ref))))
    )
    print("KERNEL_OK")
</pallas_src>

<mosaic_0001>
module attributes {stable_mosaic.version = 11 : i64} {
  func.func @_qkv_proj_kernel(%arg0: i32, %arg1: i32, %arg2: i32, %arg3: memref<1x16x32xf32, #tpu.memory_space<vmem>>, %arg4: memref<1x32x24xbf16, #tpu.memory_space<vmem>>, %arg5: memref<1x32xf32, #tpu.memory_space<vmem>>, %arg6: memref<1x32xf32, #tpu.memory_space<vmem>>, %arg7: memref<1x1x16x8xbf16, #tpu.memory_space<vmem>>, %arg8: memref<1x1x16x8xbf16, #tpu.memory_space<vmem>>, %arg9: memref<1x1x16x8xbf16, #tpu.memory_space<vmem>>, %arg10: memref<16x32xbf16, #tpu.memory_space<vmem>>) attributes {dimension_semantics = [#tpu.dimension_semantics<parallel>, #tpu.dimension_semantics<parallel>, #tpu.dimension_semantics<arbitrary>], iteration_bounds = array<i64: 2, 2, 4>, scalar_prefetch = 0 : i64, scratch_operands = 1 : i64, tpu.core_type = #tpu.core_type<tc>, window_params = [{transform_indices = @transform_0, window_bounds = array<i64: 1, 16, 32>}, {transform_indices = @transform_1, window_bounds = array<i64: 1, 32, 24>}, {pipeline_mode = #tpu.pipeline_mode<synchronous>, transform_indices = @transform_2, window_bounds = array<i64: 1, 32>}, {pipeline_mode = #tpu.pipeline_mode<synchronous>, transform_indices = @transform_3, window_bounds = array<i64: 1, 32>}, {transform_indices = @transform_4, window_bounds = array<i64: 1, 1, 16, 8>}, {transform_indices = @transform_5, window_bounds = array<i64: 1, 1, 16, 8>}, {transform_indices = @transform_6, window_bounds = array<i64: 1, 1, 16, 8>}]} {
    %c0_i32 = arith.constant 0 : i32
    %0 = arith.cmpi eq, %arg2, %c0_i32 : i32
    %1 = arith.extui %0 : i1 to i32
    %c0_i32_0 = arith.constant 0 : i32
    %2 = arith.cmpi ne, %1, %c0_i32_0 : i32
    scf.if %2 {
      %c0_17 = arith.constant 0 : index
      %c0_18 = arith.constant 0 : index
      %c0_19 = arith.constant 0 : index
      %22 = vector.load %arg3[%c0_17, %c0_18, %c0_19] : memref<1x16x32xf32, #tpu.memory_space<vmem>>, vector<1x16x32xf32>
      %23 = vector.shape_cast %22 : vector<1x16x32xf32> to vector<16x32xf32>
      %c0_20 = arith.constant 0 : index
      %c0_21 = arith.constant 0 : index
      %24 = vector.load %arg5[%c0_20, %c0_21] : memref<1x32xf32, #tpu.memory_space<vmem>>, vector<1x32xf32>
      %c0_22 = arith.constant 0 : index
      %c0_23 = arith.constant 0 : index
      %25 = vector.load %arg6[%c0_22, %c0_23] : memref<1x32xf32, #tpu.memory_space<vmem>>, vector<1x32xf32>
      %cst_24 = arith.constant dense<0.000000e+00> : vector<16xf32>
      %26 = vector.multi_reduction <add>, %23, %cst_24 [1] : vector<16x32xf32> to vector<16xf32>
      %27 = vector.shape_cast %26 : vector<16xf32> to vector<16x1xf32>
      %cst_25 = arith.constant 3.200000e+01 : f32
      %28 = vector.broadcast %cst_25 : f32 to vector<16x1xf32>
      %29 = arith.divf %27, %28 : vector<16x1xf32>
      %30 = vector.broadcast %29 : vector<16x1xf32> to vector<16x32xf32>
      %31 = arith.subf %23, %30 : vector<16x32xf32>
      %32 = arith.mulf %31, %31 : vector<16x32xf32>
      %cst_26 = arith.constant dense<0.000000e+00> : vector<16xf32>
      %33 = vector.multi_reduction <add>, %32, %cst_26 [1] : vector<16x32xf32> to vector<16xf32>
      %34 = vector.shape_cast %33 : vector<16xf32> to vector<16x1xf32>
      %cst_27 = arith.constant 3.200000e+01 : f32
      %35 = vector.broadcast %cst_27 : f32 to vector<16x1xf32>
      %36 = arith.divf %34, %35 : vector<16x1xf32>
      %37 = vector.broadcast %29 : vector<16x1xf32> to vector<16x32xf32>
      %38 = arith.subf %23, %37 : vector<16x32xf32>
      %cst_28 = arith.constant 9.99999974E-6 : f32
      %39 = vector.broadcast %cst_28 : f32 to vector<16x1xf32>
      %40 = arith.addf %36, %39 : vector<16x1xf32>
      %41 = math.rsqrt %40 : vector<16x1xf32>
      %42 = vector.broadcast %41 : vector<16x1xf32> to vector<16x32xf32>
      %43 = arith.mulf %38, %42 : vector<16x32xf32>
      %44 = vector.broadcast %24 : vector<1x32xf32> to vector<16x32xf32>
      %45 = arith.mulf %43, %44 : vector<16x32xf32>
      %46 = vector.broadcast %25 : vector<1x32xf32> to vector<16x32xf32>
      %47 = arith.addf %45, %46 : vector<16x32xf32>
      %48 = arith.truncf %47 : vector<16x32xf32> to vector<16x32xbf16>
      %c0_29 = arith.constant 0 : index
      %c0_30 = arith.constant 0 : index
      %49 = vector.load %arg10[%c0_29, %c0_30] : memref<16x32xbf16, #tpu.memory_space<vmem>>, vector<16x32xbf16>
      tpu.vector_store %arg10[%c0_29, %c0_30], %48 {strides = array<i32>} : memref<16x32xbf16, #tpu.memory_space<vmem>>, vector<16x32xbf16>,
    } else {
    }
    %c0 = arith.constant 0 : index
    %c0_1 = arith.constant 0 : index
    %3 = vector.load %arg10[%c0, %c0_1] : memref<16x32xbf16, #tpu.memory_space<vmem>>, vector<16x32xbf16>
    %c0_2 = arith.constant 0 : index
    %c0_3 = arith.constant 0 : index
    %c0_4 = arith.constant 0 : index
    %4 = vector.load %arg4[%c0_2, %c0_3, %c0_4] : memref<1x32x24xbf16, #tpu.memory_space<vmem>>, vector<1x32x24xbf16>
    %5 = vector.shape_cast %4 : vector<1x32x24xbf16> to vector<32x24xbf16>
    %cst = arith.constant dense<0.000000e+00> : vector<16x24xf32>
    %6 = tpu.matmul %3, %5, %cst {dimension_numbers = #tpu.dot_dimension_numbers<[1], [0], [0], [1], [0, 0, 1, 1], [], []>} : vector<16x32xbf16>, vector<32x24xbf16>, vector<16x24xf32> -> vector<16x24xf32>
    %7 = vector.extract_strided_slice %6 {offsets = [0, 0], sizes = [16, 8], strides = [1, 1]} : vector<16x24xf32> to vector<16x8xf32>
    %8 = arith.truncf %7 : vector<16x8xf32> to vector<16x8xbf16>
    %c0_5 = arith.constant 0 : index
    %c0_6 = arith.constant 0 : index
    %c0_7 = arith.constant 0 : index
    %c0_8 = arith.constant 0 : index
    %9 = vector.load %arg7[%c0_5, %c0_6, %c0_7, %c0_8] : memref<1x1x16x8xbf16, #tpu.memory_space<vmem>>, vector<1x1x16x8xbf16>
    %10 = vector.shape_cast %9 : vector<1x1x16x8xbf16> to vector<16x8xbf16>
    %11 = vector.shape_cast %8 : vector<16x8xbf16> to vector<1x1x16x8xbf16>
    tpu.vector_store %arg7[%c0_5, %c0_6, %c0_7, %c0_8], %11 {strides = array<i32>} : memref<1x1x16x8xbf16, #tpu.memory_space<vmem>>, vector<1x1x16x8xbf16>,
    %12 = vector.extract_strided_slice %6 {offsets = [0, 8], sizes = [16, 8], strides = [1, 1]} : vector<16x24xf32> to vector<16x8xf32>
    %13 = arith.truncf %12 : vector<16x8xf32> to vector<16x8xbf16>
    %c0_9 = arith.constant 0 : index
    %c0_10 = arith.constant 0 : index
    %c0_11 = arith.constant 0 : index
    %c0_12 = arith.constant 0 : index
    %14 = vector.load %arg8[%c0_9, %c0_10, %c0_11, %c0_12] : memref<1x1x16x8xbf16, #tpu.memory_space<vmem>>, vector<1x1x16x8xbf16>
    %15 = vector.shape_cast %14 : vector<1x1x16x8xbf16> to vector<16x8xbf16>
    %16 = vector.shape_cast %13 : vector<16x8xbf16> to vector<1x1x16x8xbf16>
    tpu.vector_store %arg8[%c0_9, %c0_10, %c0_11, %c0_12], %16 {strides = array<i32>} : memref<1x1x16x8xbf16, #tpu.memory_space<vmem>>, vector<1x1x16x8xbf16>,
    %17 = vector.extract_strided_slice %6 {offsets = [0, 16], sizes = [16, 8], strides = [1, 1]} : vector<16x24xf32> to vector<16x8xf32>
    %18 = arith.truncf %17 : vector<16x8xf32> to vector<16x8xbf16>
    %c0_13 = arith.constant 0 : index
    %c0_14 = arith.constant 0 : index
    %c0_15 = arith.constant 0 : index
    %c0_16 = arith.constant 0 : index
    %19 = vector.load %arg9[%c0_13, %c0_14, %c0_15, %c0_16] : memref<1x1x16x8xbf16, #tpu.memory_space<vmem>>, vector<1x1x16x8xbf16>
    %20 = vector.shape_cast %19 : vector<1x1x16x8xbf16> to vector<16x8xbf16>
    %21 = vector.shape_cast %18 : vector<16x8xbf16> to vector<1x1x16x8xbf16>
    tpu.vector_store %arg9[%c0_13, %c0_14, %c0_15, %c0_16], %21 {strides = array<i32>} : memref<1x1x16x8xbf16, #tpu.memory_space<vmem>>, vector<1x1x16x8xbf16>,
    return
  }
  func.func @transform_0(%arg0: i32, %arg1: i32, %arg2: i32) -> (i32, i32, i32) {
    %c0_i32 = arith.constant 0 : i32
    %c0_i32_0 = arith.constant 0 : i32
    return %arg0, %arg1, %c0_i32 : i32, i32, i32
  }
  func.func @transform_1(%arg0: i32, %arg1: i32, %arg2: i32) -> (i32, i32, i32) {
    %c0_i32 = arith.constant 0 : i32
    %c0_i32_0 = arith.constant 0 : i32
    %c0_i32_1 = arith.constant 0 : i32
    return %arg2, %c0_i32, %c0_i32_0 : i32, i32, i32
  }
  func.func @transform_2(%arg0: i32, %arg1: i32, %arg2: i32) -> (i32, i32) {
    %c0_i32 = arith.constant 0 : i32
    %c0_i32_0 = arith.constant 0 : i32
    %c0_i32_1 = arith.constant 0 : i32
    return %c0_i32, %c0_i32_0 : i32, i32
  }
  func.func @transform_3(%arg0: i32, %arg1: i32, %arg2: i32) -> (i32, i32) {
    %c0_i32 = arith.constant 0 : i32
    %c0_i32_0 = arith.constant 0 : i32
    %c0_i32_1 = arith.constant 0 : i32
    return %c0_i32, %c0_i32_0 : i32, i32
  }
  func.func @transform_4(%arg0: i32, %arg1: i32, %arg2: i32) -> (i32, i32, i32, i32) {
    %c0_i32 = arith.constant 0 : i32
    %c0_i32_0 = arith.constant 0 : i32
    return %arg0, %arg2, %arg1, %c0_i32 : i32, i32, i32, i32
  }
  func.func @transform_5(%arg0: i32, %arg1: i32, %arg2: i32) -> (i32, i32, i32, i32) {
    %c0_i32 = arith.constant 0 : i32
    %c0_i32_0 = arith.constant 0 : i32
    return %arg0, %arg2, %arg1, %c0_i32 : i32, i32, i32, i32
  }
  func.func @transform_6(%arg0: i32, %arg1: i32, %arg2: i32) -> (i32, i32, i32, i32) {
    %c0_i32 = arith.constant 0 : i32
    %c0_i32_0 = arith.constant 0 : i32
    return %arg0, %arg2, %arg1, %c0_i32 : i32, i32, i32, i32
  }
}

</mosaic_0001>

<bundles_post_ra>
// kernel: tpu_custom_call.1
= control target key start
LH: loop header
LB: loop body
LE: loop exit
PB: predicated region body
PF: predicated region fallthrough
CT: control target
= control target key end

     0   :  { %s994_s21 = smov 0   ;;  %s996_s22 = smov 0   ;;  %s1109_s0 = inlined_call_operand.vmem [shape: f32[2,32,32], index: 0, kind: input, shape index: {}]   ;;  %s1110_s1 = inlined_call_operand.vmem [shape: bf16[4,32,24], index: 1, kind: input, shape index: {}]   ;;  %s1111_s2 = inlined_call_operand.vmem [shape: f32[1,32], index: 2, kind: input, shape index: {}]   ;;  %s1112_s3 = inlined_call_operand.vmem [shape: f32[1,32], index: 3, kind: input, shape index: {}]   ;;  %s1113_s4 = inlined_call_operand.vmem [shape: bf16[2,4,32,8], index: 4, kind: output, shape index: {0}]   ;;  %s1114_s5 = inlined_call_operand.vmem [shape: bf16[2,4,32,8], index: 5, kind: output, shape index: {1}]   ;;  %s1115_s6 = inlined_call_operand.vmem [shape: bf16[2,4,32,8], index: 6, kind: output, shape index: {2}]  }
   0x1   :  { %s998_s23 = smov 0   ;;  %s1000_s24 = smov 0  }
   0x2   :  { %s1002_s25 = smov 0   ;;  %s1004_s26 = smov 0  }
   0x3   :  { %s1006_s27 = smov 0  }
   0x4 LB: > { %1117 = sst [smem:[#allocation3_spill]] %s950_s26  ;;  %s29_s28 = sadd.s32 1, %s942_s24  ;;  %s954_s27 = sphi %s1006_s27, %s17_s27   ;;  %s950_s26 = sphi %s1004_s26, %s1124_s26   ;;  %s946_s25 = sphi %s1002_s25, %s1128_s25   ;;  %s942_s24 = sphi %s1000_s24, %s1127_s24   ;;  %s938_s23 = sphi %s998_s23, %s1121_s23   ;;  %s934_s22 = sphi %s996_s22, %s1126_s22   ;;  %s930_s21 = sphi %s994_s21, %s1125_s21  }
   0x5   : > { %p30_p0 = scmp.ge.s32.totalorder %s29_s28, 4  ;;  %s32_s29 = sadd.s32 1, %s946_s25 }
   0x6   : > { %p795_p1 = scmp.ge.s32.totalorder %s954_s27, 1  ;;  %p265_p2 = scmp.lt.s32.totalorder %s954_s27, 17 }
   0x7   : > { %s1130_s28 = smov (%p30_p0, %s29_s28), 0  ;;  %s1132_s29 = smov (!%p30_p0, %s32_s29), %s946_s25 }
   0x8   : > { %1118 = sst [smem:[#allocation4_spill]] %s1130_s28  ;;  %p266_p3 = pnand %p795_p1, %p265_p2 }
   0x9   : > { %p34_p4 = scmp.ge.s32.totalorder %s1132_s29, 2  ;;  %s36_s30 = sadd.s32 1, %s950_s26 }
   0xa   : > { %s796_s7 = sshll.u32 (!%p266_p3), %s934_s22, 1  ;;  %p339_p6 = scmp.lt.s32.totalorder (!%p266_p3), %s938_s23, 1 }
   0xb   : > { %s1134_s29 = smov (%p34_p4, %s1132_s29), 0  ;;  %s1136_s30 = smov (!%p34_p4, %s36_s30), %s950_s26 }
   0xc   : > { %1119 = sst [smem:[#allocation5_spill]] %s1134_s29  ;;  %p38_p5 = scmp.ge.s32.totalorder %s1136_s30, 2 }
   0xd   : > { %269 = sbr.rel (%p266_p3) target bundleno = 573 (0x23d), region = 36  ;;  %p341_p7 = scmp.lt.s32.totalorder (!%p266_p3), %s796_s7, 3 }
   0xe   : > { %s1138_s30 = smov (%p38_p5, %s1136_s30), 0  ;;  %p348_p8 = scmp.lt.s32.totalorder (!%p266_p3), %s930_s21, 3 }
   0xf   : > { %1120 = sst [smem:[#allocation6_spill]] %s1138_s30  ;;  %p813_p9 = scmp.ne.s32.totalorder (!%p266_p3), %s930_s21, 0 }
  0x12   : > { %s1140_s23 = smov (!%p339_p6, %s938_s23), 1  ;;  %s1142_s7 = smov (!%p341_p7, %s796_s7), 3 }
  0x13   : > { %s797_s8 = sshll.u32 %s1140_s23, 2  ;;  %s803_s15 = sshll.u32 %s1140_s23, 4 }
  0x14   : > { %s344_s9 = sadd.s32 %s797_s8, %s1142_s7 }
  0x15   : > { %s798_s10 = sshll.u32 %s344_s9, 3 }
  0x16   : > { %s346_s13 = scalar_lea.vmem %s1109_s0, %s798_s10 }
  0x17   : > { %s349_s14 = scalar_select %p348_p8, %s930_s21, 3 }
  0x19   : > { %s829_s16 = sshll.u32 %s349_s14, 4  ;;  %s802_s17 = sshll.u32 %s349_s14, 2 }
  0x1a   : > { %s1046_s20 = scalar_lea.vmem %s1110_s1, %s829_s16  ;;  %s361_s22 = sadd.s32 %s802_s17, %s1142_s7 }
  0x1b   : > { %s363_s30 = sadd.s32 %s803_s15, %s361_s22  ;;  %399 = sbr.rel (%p813_p9) target bundleno = 312 (0x138), region = 40 }
  0x1c   : > { %s804_s29 = sshll.u32 %s363_s30, 2 }
  0x1d   : > { %s1051_s8 = scalar_lea.vmem %s1113_s4, %s804_s29  ;;  %s1056_s10 = scalar_lea.vmem %s1114_s5, %s804_s29 }
  0x1e   : > { %s1061_s14 = scalar_lea.vmem %s1115_s6, %s804_s29 }
  0x20   : > { %v400_v0 = vld [vmem:[%s346_s13] sm:$0xff]  ;;  %vm404_vm0 = vcmask 261120   ;;  %v401_v2 = vld [vmem:[%s346_s13 + $0x8] sm:$0xff]  ;;  %v956_v4 = vmov 32.0   ;;  %vm468_vm6 = vcmask 257024  }
  0x21   : > { %v405_v1 = vsel %vm404_vm0, %v400_v0, 0.0  ;;  %v408_v3 = vsel %vm404_vm0, %v401_v2, 0.0  ;;  %894 = vrcp.f32 %v956_v4  ;;  %v892_v35 = vld [vmem:[%s1111_s2] ss:$0 sm:$0xff] }
  0x22   : > { %406 = vadd.xlane.f32.xlu0 %v405_v1  ;;  %v893_v38 = vld [vmem:[%s1112_s3] ss:$0 sm:$0xff] }
  0x27   : > { %v895_v5 = vpop.eup %894 }
  0x28   : > { %v412_v6 = vmul.f32 32.0, %v895_v5  ;;  %vm416_vm1 = vweird.f32 %v895_v5 }
  0x2a   : > { %409 = vadd.xlane.f32.xlu0 %v408_v3  ;;  %v413_v7 = vsub.f32 1.0, %v412_v6 }
  0x2c   : > { %v414_v8 = vmul.f32 %v895_v5, %v413_v7 }
  0x2e   : > { %v415_v9 = vadd.f32 %v895_v5, %v414_v8 }
  0x30   : > { %v417_v10 = vsel %vm416_vm1, %v895_v5, %v415_v9 }
  0x95   : > { %v407_v11 = vpop.xlane.xlu0 %406 }
  0x96   : > { %v418_v12 = vmul.f32 %v417_v10, %v407_v11 }
  0x98   : > { %v420_v13 = vsub.f32 %v400_v0, %v418_v12 }
  0x9a   : > { %v422_v14 = vmul.f32 %v420_v13, %v420_v13 }
  0x9c   : > { %v424_v15 = vsel %vm404_vm0, %v422_v14, 0.0 }
  0x9d   : > { %425 = vadd.xlane.f32.xlu1 %v424_v15  ;;  %v410_v16 = vpop.xlane.xlu0 %409 }
  0x9e   : > { %v419_v17 = vmul.f32 %v417_v10, %v410_v16 }
  0xa0   : > { %v421_v18 = vsub.f32 %v401_v2, %v419_v17 }
  0xa2   : > { %v423_v19 = vmul.f32 %v421_v18, %v421_v18 }
  0xa4   : > { %v427_v20 = vsel %vm404_vm0, %v423_v19, 0.0 }
  0xa5   : > { %428 = vadd.xlane.f32.xlu1 %v427_v20 }
 0x110   : > { %v426_v21 = vpop.xlane.xlu1 %425 }
 0x111   : > { %v430_v22 = vmul.f32 %v426_v21, %v417_v10 }
 0x113   : > { %v432_v23 = vadd.f32 1e-05, %v430_v22 }
 0x115   : > { %896 = vrsqrt.f32 %v432_v23  ;;  %vm440_vm3 = vweird.f32 %v432_v23 }
 0x118   : > { %v429_v24 = vpop.xlane.xlu1 %428 }
 0x119   : > { %v431_v25 = vmul.f32 %v429_v24, %v417_v10 }
 0x11b   : > { %v897_v26 = vpop.eup %896  ;;  %v433_v27 = vadd.f32 1e-05, %v431_v25 }
 0x11c   : > { %v435_v28 = vmul.f32 %v897_v26, %v432_v23  ;;  %vm441_vm2 = vweird.f32 %v897_v26 }
 0x11d   : > { %898 = vrsqrt.f32 %v433_v27  ;;  %vm442_vm4 = vmor %vm440_vm3, %vm441_vm2  ;;  %vm450_vm7 = vweird.f32 %v433_v27 }
 0x11e   : > { %v436_v29 = vmul.f32 %v897_v26, %v435_v28 }
 0x120   : > { %v437_v30 = vmul.f32 0.5, %v436_v29 }
 0x122   : > { %v438_v31 = vsub.f32 1.5, %v437_v30 }
 0x123   : > { %v899_v32 = vpop.eup %898 }
 0x124   : > { %v439_v33 = vmul.f32 %v897_v26, %v438_v31  ;;  %v445_v34 = vmul.f32 %v899_v32, %v433_v27  ;;  %vm451_vm5 = vweird.f32 %v899_v32 }
 0x125   : > { %vm452_vm8 = vmor %vm450_vm7, %vm451_vm5 }
 0x126   : > { %v443_v36 = vsel %vm442_vm4, %v897_v26, %v439_v33  ;;  %v446_v37 = vmul.f32 %v899_v32, %v445_v34 }
 0x127   : > { %v454_v39 = vmul.f32 %v443_v36, %v420_v13 }
 0x128   : > { %v447_v40 = vmul.f32 0.5, %v446_v37 }
 0x129   : > { %v459_v41 = vmul.f32 %v892_v35, %v454_v39 }
 0x12a   : > { %v448_v42 = vsub.f32 1.5, %v447_v40 }
 0x12b   : > { %v464_v43 = vadd.f32 %v893_v38, %v459_v41 }
 0x12c   : > { %v449_v44 = vmul.f32 %v899_v32, %v448_v42 }
 0x12d   : > { %v466_v45 = vpack.c.bf16 %v464_v43, %v464_v43 }
 0x12e   : > { %v453_v46 = vsel %vm452_vm8, %v899_v32, %v449_v44 }
 0x12f   : > { %469 = vst.msk [vmem:[#allocation2] sm:$0xf] %vm468_vm6, %v466_v45  ;;  %v455_v47 = vmul.f32 %v453_v46, %v421_v18 }
 0x131   : > { %v460_v48 = vmul.f32 %v892_v35, %v455_v47 }
 0x133   : > { %v465_v49 = vadd.f32 %v893_v38, %v460_v48 }
 0x135   : > { %v467_v50 = vpack.c.bf16 %v465_v49, %v465_v49 }
 0x137   : > { %470 = vst.msk [vmem:[#allocation2 + $0x4] sm:$0xf] %vm468_vm6, %v467_v50 }
 0x138 PF: > { %v832_v51 = vld [vmem:[%s1046_s20 + $0x8] sm:$0xff]  ;;  %v831_v52 = vld [vmem:[%s1046_s20] sm:$0xff]  ;;  %vm494_vm9 = vcmask 261120   ;;  %vm514_vm10 = vcmask 60416   ;;  %s957_s30 = smov 112   ;;  %s958_s7 = smov 120  }
 0x139   : > { %504 = vmatpush.bf16.msra.mxu0 %v832_v51 }
 0x13d   : > { %505 = vmatpush.bf16.msra.mxu0 %v831_v52 }
 0x13e   : > { %v830_v53 = vld [vmem:[#allocation2] sm:$0xff] }
 0x140   : > { %826 = vmatmul.msk.bf16.vlgmr.msra.gmra.mxu0 %vm494_vm9, %v830_v53 }
 0x1bd   : > { %v507_v54 = vpop.f32.mrf.mxu0 }
 0x1be   : > { %v512_v55 = vpack.c.bf16 %v507_v54, %v507_v54 }
 0x1c0   : > { %515 = vst.msk [vmem:[%s1051_s8] sm:$0xf] %vm514_vm10, %v512_v55  ;;  %527 = vrot.lane.b32.xlu1 %v512_v55, %s957_s30  ;;  %519 = vrot.lane.b32.xlu0 %v512_v55, %s958_s7 }
 0x1c5   : > { %v509_v56 = vpop.f32.mrf.mxu0 }
 0x1c6   : > { %v513_v57 = vpack.c.bf16 %v509_v56, %v509_v56 }
 0x1c8   : > { %516 = vst.msk [vmem:[%s1051_s8 + $0x4] sm:$0xf] %vm514_vm10, %v513_v57  ;;  %529 = vrot.lane.b32.xlu1 %v513_v57, %s957_s30  ;;  %521 = vrot.lane.b32.xlu0 %v513_v57, %s958_s7 }
 0x232   : > { %v528_v58 = vpop.permute.xlu1 %527  ;;  %v520_v59 = vpop.permute.xlu0 %519 }
 0x233   : > { %533 = vst.msk [vmem:[%s1061_s14] sm:$0xf] %vm514_vm10, %v528_v58 }
 0x234   : > { %525 = vst.msk [vmem:[%s1056_s10] sm:$0xf] %vm514_vm10, %v520_v59 }
 0x23a   : > { %v530_v60 = vpop.permute.xlu1 %529  ;;  %v522_v61 = vpop.permute.xlu0 %521 }
 0x23b   : > { %534 = vst.msk [vmem:[%s1061_s14 + $0x4] sm:$0xf] %vm514_vm10, %v530_v60 }
 0x23c   : > { %526 = vst.msk [vmem:[%s1056_s10 + $0x4] sm:$0xf] %vm514_vm10, %v522_v61 }
 0x23d PF: > { %s17_s27 = sadd.s32 1, %s954_s27   ;;  %s1121_s23 = sld [smem:[#allocation3_spill]] }
 0x23e   : > { %p14_p10 = scmp.ge.s32.totalorder %s17_s27, 18   ;;  %s1122_s13 = sld [smem:[#allocation4_spill]] }
 0x23f   : > { %s1123_s15 = sld [smem:[#allocation5_spill]]  ;;  %s1125_s21 = smov %s942_s24 }
 0x240   : > { %s1124_s26 = sld [smem:[#allocation6_spill]]  ;;  %s1126_s22 = smov %s946_s25 }
 0x241   :  { %16 = sbr.rel (!%p14_p10) target bundleno = 4 (0x4), region = 97 }
 0x244   : > { %s1127_s24 = smov %s1122_s13 }
 0x245   : > { %s1128_s25 = smov %s1123_s15 }

</bundles_post_ra>
